<compile_context>
chip_gen: v7x
topology: tpu7x:2x2x1
jax: 0.10.0
libtpu: 0.0.40
codegen_flags: <defaults>
</compile_context>

<pallas_src>
import functools

import jax
import jax.numpy as jnp
from jax.experimental import pallas as pl
from jax.experimental.pallas import tpu as pltpu


def _eca_kernel(wk_ref, x_ref, o_ref, mpad_ref, *, k, pad, inv_hw):
    """wk_ref: (k,) f32 SMEM (scalar-prefetched conv taps).
    x_ref / o_ref: (tb, c, hw) VMEM block (lane-dense spatial axis).
    mpad_ref: (tb, c + 2*pad, 1) f32 VMEM scratch (zero-padded channel means)."""
    tb, c, _ = x_ref.shape

    # Per-channel mean, f32 accumulation, channels kept on the sublane axis.
    s = jnp.sum(x_ref[...], axis=-1, keepdims=True, dtype=jnp.float32) * inv_hw

    # Zero-padded means; k sublane-shifted reads implement the channel conv
    # with exactly PyTorch's zero-padding semantics.
    mpad_ref[...] = jnp.zeros_like(mpad_ref)
    mpad_ref[:, pad:pad + c, :] = s

    acc = jnp.zeros((tb, c, 1), jnp.float32)
    for t in range(k):                       # k is a small compile-time constant
        acc = acc + wk_ref[t] * mpad_ref[:, t:t + c, :]

    gate = jax.nn.sigmoid(acc).astype(o_ref.dtype)        # (tb, c, 1)
    o_ref[...] = x_ref[...] * gate                        # lane-broadcast apply


def _vmem_capacity_bytes():
    try:
        return int(pltpu.get_tpu_info().vmem_capacity_bytes)
    except Exception:
        return 64 * 1024 * 1024   # conservative (v7x per-TensorCore VMEM)


def _pick_tb(b, row_bytes, target_block_bytes):
    """Largest divisor of b whose block fits the target, keeping the grid >= 2."""
    best = 1
    for tb in range(1, b + 1):
        if b % tb:
            continue
        if tb * row_bytes > target_block_bytes:
            continue
        if b >= 2 and b // tb < 2:
            continue          # keep >= 2 parallel grid steps for v7x megacore
        best = tb
    return best


def eca_layer_pallas(x, conv_weight):
    """x: (b, c, h, w); conv_weight: PyTorch Conv1d weight of shape (1, 1, k)."""
    b, c, h, w = x.shape
    k = int(conv_weight.size)             # static (shape-derived) even under jit
    pad = (k - 1) // 2
    wk = jnp.asarray(conv_weight, jnp.float32).reshape(k)

    hw = h * w
    x_r = x.reshape(b, c, hw)             # free view; no padding, no extra HBM copies

    itemsize = jnp.dtype(x.dtype).itemsize
    row_bytes = c * hw * itemsize

    # Size blocks and vmem limit from the real footprint:
    #   2x double-buffered input block + 2x double-buffered output block + scratch.
    vmem_cap = _vmem_capacity_bytes()
    target_block = min(8 * 1024 * 1024, max(512 * 1024, (vmem_cap // 2) // 4))
    tb = _pick_tb(b, row_bytes, target_block)

    block_bytes = tb * row_bytes
    scratch_bytes = tb * (c + 2 * pad) * 4
    needed = 4 * block_bytes + scratch_bytes + (2 << 20)
    vmem_limit = int(min(max(needed, 32 * 1024 * 1024), int(vmem_cap * 0.9)))

    grid = (b // tb,)
    kernel = functools.partial(_eca_kernel, k=k, pad=pad, inv_hw=1.0 / float(hw))

    out = pl.pallas_call(
        kernel,
        out_shape=jax.ShapeDtypeStruct((b, c, hw), x.dtype),
        grid_spec=pltpu.PrefetchScalarGridSpec(
            num_scalar_prefetch=1,                        # conv taps -> SMEM
            grid=grid,
            in_specs=[pl.BlockSpec((tb, c, hw), lambda i, wk_ref: (i, 0, 0))],
            out_specs=pl.BlockSpec((tb, c, hw), lambda i, wk_ref: (i, 0, 0)),
            scratch_shapes=[pltpu.VMEM((tb, c + 2 * pad, 1), jnp.float32)],
        ),
        compiler_params=pltpu.CompilerParams(
            dimension_semantics=("parallel",),
            vmem_limit_bytes=vmem_limit,
        ),
    )(wk, x_r)

    # TODO(synk): add a spatial-split path for b == 1 on v7x (mean pre-pass +
    # gate-apply grid over (batch, spatial blocks)) and as a fallback when a
    # single (c, hw) row exceeds the per-core VMEM budget.
    return out.reshape(b, c, h, w)


def eca_layer_ref(x, conv_weight):
    """Pure-JAX reference mirroring the PyTorch ECALayer forward."""
    b, c, h, w = x.shape
    k = int(conv_weight.size)
    pad = (k - 1) // 2
    wk = conv_weight.reshape(k).astype(jnp.float32)

    y = jnp.mean(x.astype(jnp.float32), axis=(2, 3))        # (b, c)
    yp = jnp.pad(y, ((0, 0), (pad, pad)))
    conv = jnp.zeros_like(y)
    for t in range(k):                                      # cross-correlation
        conv = conv + wk[t] * yp[:, t:t + c]
    gate = jax.nn.sigmoid(conv)[:, :, None, None]
    return (x * gate).astype(x.dtype)


if __name__ == "__main__":
    key = jax.random.PRNGKey(0)
    k1, k2, k3, k4 = jax.random.split(key, 4)

    # Case 1: classic ECA shape, hw a multiple of 128.
    x1 = jax.random.normal(k1, (2, 64, 16, 16), dtype=jnp.float32)
    w1 = 0.5 * jax.random.normal(k2, (1, 1, 3), dtype=jnp.float32)
    out1 = jax.block_until_ready(eca_layer_pallas(x1, w1))
    if not jnp.allclose(out1, eca_layer_ref(x1, w1), atol=1e-5, rtol=1e-5):
        raise AssertionError("Pallas ECA kernel mismatch vs reference (case 1)")

    # Case 2: hw NOT a multiple of 128 (exercises the pad-free masked-tail path), k=5.
    x2 = jax.random.normal(k3, (2, 48, 10, 10), dtype=jnp.float32)
    w2 = 0.5 * jax.random.normal(k4, (1, 1, 5), dtype=jnp.float32)
    out2 = jax.block_until_ready(eca_layer_pallas(x2, w2))
    if not jnp.allclose(out2, eca_layer_ref(x2, w2), atol=1e-5, rtol=1e-5):
        raise AssertionError("Pallas ECA kernel mismatch vs reference (case 2)")

    print("KERNEL_OK")
</pallas_src>

<mosaic_0001>
module attributes {stable_mosaic.version = 11 : i64} {
  func.func @_eca_kernel(%arg0: i32, %arg1: memref<3xf32, #tpu.memory_space<smem>>, %arg2: memref<1x64x256xf32, #tpu.memory_space<vmem>>, %arg3: memref<1x64x256xf32, #tpu.memory_space<vmem>>, %arg4: memref<1x66x1xf32, #tpu.memory_space<vmem>>) attributes {dimension_semantics = [#tpu.dimension_semantics<parallel>], iteration_bounds = array<i64: 2>, scalar_prefetch = 1 : i64, scratch_operands = 1 : i64, tpu.core_type = #tpu.core_type<tc>, window_params = [{transform_indices = @transform_0, window_bounds = array<i64: 1, 64, 256>}, {transform_indices = @transform_1, window_bounds = array<i64: 1, 64, 256>}]} {
    %c0 = arith.constant 0 : index
    %c0_0 = arith.constant 0 : index
    %c0_1 = arith.constant 0 : index
    %0 = vector.load %arg2[%c0, %c0_0, %c0_1] : memref<1x64x256xf32, #tpu.memory_space<vmem>>, vector<1x64x256xf32>
    %cst = arith.constant dense<0.000000e+00> : vector<1x64xf32>
    %1 = vector.multi_reduction <add>, %0, %cst [2] : vector<1x64x256xf32> to vector<1x64xf32>
    %2 = vector.shape_cast %1 : vector<1x64xf32> to vector<1x64x1xf32>
    %cst_2 = arith.constant 3.906250e-03 : f32
    %3 = vector.broadcast %cst_2 : f32 to vector<1x64x1xf32>
    %4 = arith.mulf %2, %3 : vector<1x64x1xf32>
    %cst_3 = arith.constant 0.000000e+00 : f32
    %5 = vector.broadcast %cst_3 : f32 to vector<1x66x1xf32>
    %c0_4 = arith.constant 0 : index
    %c0_5 = arith.constant 0 : index
    %c0_6 = arith.constant 0 : index
    %6 = vector.load %arg4[%c0_4, %c0_5, %c0_6] : memref<1x66x1xf32, #tpu.memory_space<vmem>>, vector<1x66x1xf32>
    tpu.vector_store %arg4[%c0_4, %c0_5, %c0_6], %5 {strides = array<i32>} : memref<1x66x1xf32, #tpu.memory_space<vmem>>, vector<1x66x1xf32>,
    %c0_7 = arith.constant 0 : index
    %c1 = arith.constant 1 : index
    %c0_8 = arith.constant 0 : index
    %7 = vector.load %arg4[%c0_7, %c1, %c0_8] : memref<1x66x1xf32, #tpu.memory_space<vmem>>, vector<1x64x1xf32>
    tpu.vector_store %arg4[%c0_7, %c1, %c0_8], %4 {strides = array<i32>} : memref<1x66x1xf32, #tpu.memory_space<vmem>>, vector<1x64x1xf32>,
    %cst_9 = arith.constant 0.000000e+00 : f32
    %8 = vector.broadcast %cst_9 : f32 to vector<1x64x1xf32>
    %c0_10 = arith.constant 0 : index
    %9 = memref.load %arg1[%c0_10] : memref<3xf32, #tpu.memory_space<smem>>
    %c0_11 = arith.constant 0 : index
    %c0_12 = arith.constant 0 : index
    %c0_13 = arith.constant 0 : index
    %10 = vector.load %arg4[%c0_11, %c0_12, %c0_13] : memref<1x66x1xf32, #tpu.memory_space<vmem>>, vector<1x64x1xf32>
    %11 = vector.broadcast %9 : f32 to vector<1x64x1xf32>
    %12 = arith.mulf %11, %10 : vector<1x64x1xf32>
    %13 = arith.addf %8, %12 : vector<1x64x1xf32>
    %c1_14 = arith.constant 1 : index
    %14 = memref.load %arg1[%c1_14] : memref<3xf32, #tpu.memory_space<smem>>
    %c0_15 = arith.constant 0 : index
    %c1_16 = arith.constant 1 : index
    %c0_17 = arith.constant 0 : index
    %15 = vector.load %arg4[%c0_15, %c1_16, %c0_17] : memref<1x66x1xf32, #tpu.memory_space<vmem>>, vector<1x64x1xf32>
    %16 = vector.broadcast %14 : f32 to vector<1x64x1xf32>
    %17 = arith.mulf %16, %15 : vector<1x64x1xf32>
    %18 = arith.addf %13, %17 : vector<1x64x1xf32>
    %c2 = arith.constant 2 : index
    %19 = memref.load %arg1[%c2] : memref<3xf32, #tpu.memory_space<smem>>
    %c0_18 = arith.constant 0 : index
    %c2_19 = arith.constant 2 : index
    %c0_20 = arith.constant 0 : index
    %20 = vector.load %arg4[%c0_18, %c2_19, %c0_20] : memref<1x66x1xf32, #tpu.memory_space<vmem>>, vector<1x64x1xf32>
    %21 = vector.broadcast %19 : f32 to vector<1x64x1xf32>
    %22 = arith.mulf %21, %20 : vector<1x64x1xf32>
    %23 = arith.addf %18, %22 : vector<1x64x1xf32>
    %24 = arith.negf %23 : vector<1x64x1xf32>
    %25 = math.exp %24 : vector<1x64x1xf32>
    %cst_21 = arith.constant 1.000000e+00 : f32
    %26 = vector.broadcast %cst_21 : f32 to vector<1x64x1xf32>
    %27 = arith.addf %26, %25 : vector<1x64x1xf32>
    %28 = arith.divf %26, %27 : vector<1x64x1xf32>
    %c0_22 = arith.constant 0 : index
    %c0_23 = arith.constant 0 : index
    %c0_24 = arith.constant 0 : index
    %29 = vector.load %arg2[%c0_22, %c0_23, %c0_24] : memref<1x64x256xf32, #tpu.memory_space<vmem>>, vector<1x64x256xf32>
    %30 = vector.broadcast %28 : vector<1x64x1xf32> to vector<1x64x256xf32>
    %31 = arith.mulf %29, %30 : vector<1x64x256xf32>
    %c0_25 = arith.constant 0 : index
    %c0_26 = arith.constant 0 : index
    %c0_27 = arith.constant 0 : index
    %32 = vector.load %arg3[%c0_25, %c0_26, %c0_27] : memref<1x64x256xf32, #tpu.memory_space<vmem>>, vector<1x64x256xf32>
    tpu.vector_store %arg3[%c0_25, %c0_26, %c0_27], %31 {strides = array<i32>} : memref<1x64x256xf32, #tpu.memory_space<vmem>>, vector<1x64x256xf32>,
    return
  }
  func.func @transform_0(%arg0: i32, %arg1: memref<3xf32, #tpu.memory_space<smem>>) -> (i32, i32, i32) {
    %c0_i32 = arith.constant 0 : i32
    %c0_i32_0 = arith.constant 0 : i32
    %c0_i32_1 = arith.constant 0 : i32
    return %arg0, %c0_i32, %c0_i32_0 : i32, i32, i32
  }
  func.func @transform_1(%arg0: i32, %arg1: memref<3xf32, #tpu.memory_space<smem>>) -> (i32, i32, i32) {
    %c0_i32 = arith.constant 0 : i32
    %c0_i32_0 = arith.constant 0 : i32
    %c0_i32_1 = arith.constant 0 : i32
    return %arg0, %c0_i32, %c0_i32_0 : i32, i32, i32
  }
}

</mosaic_0001>

<bundles_post_ra>
// kernel: tpu_custom_call.1
= control target key start
LH: loop header
LB: loop body
LE: loop exit
PB: predicated region body
PF: predicated region fallthrough
CT: control target
= control target key end

     0   :  { %s1080_s0 = inlined_call_operand.hbm [shape: f32[3], index: 0, kind: input, shape index: {}]   ;;  %s1081_s1 = inlined_call_operand.hbm [shape: f32[2,64,256], index: 1, kind: input, shape index: {}]   ;;  %s1082_s2 = inlined_call_operand.hbm [shape: f32[2,64,256], index: 2, kind: output, shape index: {}]  }
   0x1   :  { %s621_s11 = scalar_lea.hbm %s1080_s0, 16 }
   0x2   :  { %p622_p0 = scmp.ne.s32.totalorder %s1080_s0, %s621_s11  ;;  %p625_p1 = scmp.lt.u32.totalorder %s621_s11, %s1080_s0 }
   0x4   :  { %p627_p2 = pnand %p625_p1, %p622_p0 }
   0x6   :  { %630 = shalt.err (!%p627_p2)  }
   0x7   :  { %s731_s16 = smov [#allocation4]  }
   0x8   :  { %8 = dma.hbm_to_smem %s1080_s0, 16, %s731_s16, [#allocation3] }
   0x9   :  { %705 = dma.done.wait [#allocation3], 16 }
   0xa   :  { %706 = vsyncadd [#allocation3], 4294967280 }
   0xb   :  { %10 = sfence }
   0xc   :  { %11 = vsyncpa [#allocation6], 0 }
   0xd   :  { %13 = vsyncpa [#allocation6 + $0x1], 0 }
   0xe   :  { %14 = vsyncpa [#allocation7], 0 }
   0xf   :  { %16 = vsyncpa [#allocation7 + $0x1], 0  ;;  %s767_s19 = smov 0   ;;  %s769_s20 = smov 0  }
  0x10   :  { %s771_s21 = smov 0   ;;  %s773_s22 = smov 0  }
  0x11 LB: > { %s788_s0 = sadd.s32 4294967295, %s729_s22   ;;  %s508_s23 = sadd.s32 4294967294, %s729_s22   ;;  %s729_s22 = sphi %s773_s22, %s1095_s22   ;;  %s725_s21 = sphi %s771_s21, %s1094_s21   ;;  %s721_s20 = sphi %s769_s20, %s1093_s20   ;;  %s717_s19 = sphi %s767_s19, %s1092_s19  }
  0x12   : > { %s792_s24 = sadd.s32 1, %s729_s22   ;;  %s29_s25 = sadd.s32 1, %s725_s21 }
  0x13   : > { %s26_s26 = ssub.s32 %s729_s22, %s792_s24  ;;  %p36_p3 = scmp.ne.s32.totalorder %s725_s21, %s721_s20 }
  0x14   : > { %p27_p4 = scmp.eq.s32.totalorder %s26_s26, 0  ;;  %p37_p5 = scmp.eq.s32.totalorder %s729_s22, 0 }
  0x15   : > { %p42_p6 = scmp.ne.s32.totalorder %s721_s20, %s717_s19  ;;  %p43_p7 = scmp.eq.s32.totalorder %s788_s0, 0 }
  0x16   : > { %s804_s27 = scalar_select %p27_p4, %s725_s21, %s29_s25  }
  0x17   : > { %p806_p8 = por %p37_p5, %p36_p3  ;;  %p810_p9 = por %p43_p7, %p42_p6 }
  0x18   : > { %p66_p10 = scmp.eq.s32.totalorder %s788_s0, 1  ;;  %p72_p11 = scmp.eq.s32.totalorder %s508_s23, 1 }
  0x19   : > { %p546_p13 = scmp.lt.s32.totalorder %s729_s22, 2  ;;  %s92_s4 = sand.u32 1, %s725_s21  }
  0x1a   : > { %p817_p0 = por %p66_p10, %p36_p3  ;;  %p821_p1 = por %p72_p11, %p42_p6 }
  0x1b   : > { %s532_s5 = sshll.u32 %s729_s22, 11  ;;  %s511_s6 = sshll.u32 %s92_s4, 7 }
  0x1c   : > { %s1086_s30 = scalar_select %p817_p0, 1, 0 }
  0x1d   : > { %s1087_s3 = scalar_select %p821_p1, 1, 0 }
  0x1e   : > { %s830_s9 = scalar_lea.hbm %s1081_s1, %s532_s5  ;;  %s96_s10 = scalar_lea.vmem [#allocation5], %s511_s6 }
  0x1f   : > { %s103_s11 = sshll.u32 %s96_s10, 4  ;;  %p834_p2 = pnand %p546_p13, %p806_p8  ;;  %s838_s11 = int_to_ptr.vmem [resolvable:$true] %s103_s11 }
  0x20   : > { %s840_s13 = scalar_lea.sflag [#allocation6], %s92_s4  ;;  %s631_s14 = scalar_lea.hbm %s830_s9, 2048 }
  0x21   : > { %p632_p3 = scmp.ne.s32.totalorder %s830_s9, %s631_s14  ;;  %p633_p4 = pneg %p834_p2 }
  0x22   : > { %s636_s17 = scalar_lea.hbm %s1081_s1, 4096  ;;  %p637_p7 = scmp.lt.u32.totalorder %s830_s9, %s1081_s1 }
  0x23   : > { %p634_p5 = pnand %p633_p4, %p632_p3  ;;  %p638_p8 = scmp.lt.u32.totalorder %s636_s17, %s631_s14 }
  0x24   : > { %p640_p11 = scmp.lt.u32.totalorder %s631_s14, %s830_s9 }
  0x25   : > { %p635_p6 = pneg %p634_p5  ;;  %p639_p10 = por %p638_p8, %p637_p7 }
  0x27   : > { %p641_p13 = por %p640_p11, %p639_p10 }
  0x29   : > { %p642_p12 = pnand %p641_p13, %p635_p6 }
  0x2b   : > { %645 = shalt.err (!%p642_p12)
}
  0x2c   : > { %s646_s25 = scalar_lea.vmem %s838_s11, 2048  ;;  %s732_s26 = smov [#allocation5]  }
  0x2d   : > { %p647_p3 = scmp.ne.s32.totalorder %s838_s11, %s646_s25  ;;  %s651_s28 = sshll.u32 %s732_s26, 4  ;;  %s652_s28 = int_to_ptr.vmem [resolvable:$false] %s651_s28 }
  0x2e   : > { %s653_s4 = scalar_lea.vmem %s652_s28, 4096  ;;  %p654_p0 = scmp.lt.s32.totalorder %s838_s11, %s652_s28 }
  0x2f   : > { %p649_p5 = pnand %p647_p3, %p633_p4  ;;  %p655_p7 = scmp.lt.s32.totalorder %s653_s4, %s646_s25 }
  0x31   : > { %p650_p1 = pneg %p649_p5  ;;  %p656_p8 = por %p655_p7, %p654_p0 }
  0x33   : > { %p657_p10 = pnand %p656_p8, %p650_p1 }
  0x35   : > { %660 = shalt.err (!%p657_p10)
}
  0x36   : > { %s733_s5 = smov 256   ;;  %s734_s6 = smov 16  }
  0x37   : > { %541 = dma.hbm_to_vmem [thread:$0]  (!%p834_p2), %s830_s9, 2048, %s838_s11, %s840_s13, %s733_s5, %s733_s5, %s734_s6  }
  0x38   : > { %p514_p12 = scmp.ge.s32.totalorder %s729_s22, 1  ;;  %p111_p4 = scmp.lt.s32.totalorder %s729_s22, 3 }
  0x3a   : > { %p112_p6 = pnand %p514_p12, %p111_p4 }
  0x3b   : > { %s871_s7 = sand.u32 (!%p112_p6), 1, %s721_s20  }
  0x3c   : > { %115 = sbr.rel (%p112_p6) target bundleno = 430 (0x1ae), region = 24  ;;  %s515_s8 = sshll.u32 (!%p112_p6), %s871_s7, 7 }
  0x3d   : > { %s118_s10 = scalar_lea.sflag (!%p112_p6), [#allocation6], %s871_s7  ;;  %s877_s14 = scalar_lea.vmem (!%p112_p6), [#allocation5], %s515_s8 }
  0x43   : > { %708 = dma.done.wait (%p810_p9), %s118_s10, 2048  }
  0x44   : > { %710 = vsyncadd (%p810_p9), %s118_s10, 4294965248  ;;  %vm188_vm0 = vcmask 7168   ;;  %v735_v0 = vmov 0.0   ;;  %v892_v1 = vld [vmem:[%s877_s14] sm:$0xff]  ;;  %v895_v2 = vld [vmem:[%s877_s14 + $0x8] sm:$0xff]  ;;  %vm197_vm1 = vcmask 1024  }
  0x45   : > { %189 = vst.msk [vmem:[#allocation2] sm:$0xff] %vm188_vm0, %v735_v0  ;;  %190 = vst.msk [vmem:[#allocation2 + $0x8] sm:$0xff] %vm188_vm0, %v735_v0  ;;  %v898_v3 = vld [vmem:[%s877_s14 + $0x20] sm:$0xff]  ;;  %v156_v4 = vadd.f32 %v895_v2, %v892_v1  ;;  %v903_v5 = vld [vmem:[%s877_s14 + $0x28] sm:$0xff]  ;;  %v736_v25 = vmov 0   ;;  %s207_s29 = sld [smem:[#allocation4]] }
  0x46   : > { %191 = vst.msk [vmem:[#allocation2 + $0x10] sm:$0xff] %vm188_vm0, %v735_v0  ;;  %192 = vst.msk [vmem:[#allocation2 + $0x18] sm:$0xff] %vm188_vm0, %v735_v0  ;;  %v906_v6 = vld [vmem:[%s877_s14 + $0x10] sm:$0xff]  ;;  %v909_v7 = vld [vmem:[%s877_s14 + $0x18] sm:$0xff]  ;;  %v162_v8 = vadd.f32 %v903_v5, %v898_v3  ;;  %587 = vset.pattern.permute.xlu0 %v736_v25  ;;  %588 = vset.pattern.permute.xlu1 %v736_v25  ;;  %s517_s9 = sld [smem:[#allocation4 + $0x1]]  ;;  %s518_s11 = sld [smem:[#allocation4 + $0x2]] }
  0x47   : > { %193 = vst.msk [vmem:[#allocation2 + $0x20] sm:$0xff] %vm188_vm0, %v735_v0  ;;  %194 = vst.msk [vmem:[#allocation2 + $0x28] sm:$0xff] %vm188_vm0, %v735_v0  ;;  %v914_v9 = vld [vmem:[%s877_s14 + $0x30] sm:$0xff]  ;;  %v917_v10 = vld [vmem:[%s877_s14 + $0x38] sm:$0xff]  ;;  %157 = vadd.xlane.f32.xlu0 %v156_v4  ;;  %v159_v11 = vadd.f32 %v909_v7, %v906_v6  ;;  %s997_s12 = scalar_lea.vmem [#allocation8], %s515_s8  ;;  %s533_s13 = sshll.u32 %s788_s0, 11 }
  0x48   : > { %195 = vst.msk [vmem:[#allocation2 + $0x30] sm:$0xff] %vm188_vm0, %v735_v0  ;;  %196 = vst.msk [vmem:[#allocation2 + $0x38] sm:$0xff] %vm188_vm0, %v735_v0  ;;  %163 = vadd.xlane.f32.xlu1 %v162_v8  ;;  %v165_v12 = vadd.f32 %v917_v10, %v914_v9  ;;  %v924_v13 = vld [vmem:[%s877_s14 + $0x40] sm:$0xff]  ;;  %v927_v14 = vld [vmem:[%s877_s14 + $0x48] sm:$0xff]  ;;  %s435_s15 = sshll.u32 %s997_s12, 4  ;;  %s1030_s18 = scalar_lea.hbm %s1082_s2, %s533_s13  ;;  %s1032_s15 = int_to_ptr.vmem [resolvable:$true] %s435_s15 }
  0x49   : > { %v930_v15 = vld [vmem:[%s877_s14 + $0x50] sm:$0xff]  ;;  %v933_v16 = vld [vmem:[%s877_s14 + $0x58] sm:$0xff]  ;;  %v168_v17 = vadd.f32 %v927_v14, %v924_v13  ;;  %v940_v19 = vld [vmem:[%s877_s14 + $0x60] sm:$0xff]  ;;  %198 = vst.msk [vmem:[#allocation2 + $0x40] sm:$0x3] %vm197_vm1, %v735_v0  ;;  %s422_s0 = scalar_lea.sflag [#allocation7], %s871_s7 }
  0x4a   : > { %v171_v18 = vadd.f32 %v933_v16, %v930_v15  ;;  %v943_v20 = vld [vmem:[%s877_s14 + $0x68] sm:$0xff]  ;;  %v946_v21 = vld [vmem:[%s877_s14 + $0x70] sm:$0xff]  ;;  %v949_v22 = vld [vmem:[%s877_s14 + $0x78] sm:$0xff]  ;;  %s661_s23 = scalar_lea.vmem %s1032_s15, 2048  ;;  %p1089_p0 = scmp.ne.s32.totalorder %s1086_s30, 0 }
  0x4b   : > { %160 = vadd.xlane.f32.xlu0 %v159_v11  ;;  %v174_v23 = vadd.f32 %v943_v20, %v940_v19  ;;  %v177_v24 = vadd.f32 %v949_v22, %v946_v21  ;;  %v959_v35 = vstv %s207_s29  ;;  %p662_p9 = scmp.ne.s32.totalorder %s1032_s15, %s661_s23  ;;  %s737_s25 = smov [#allocation8]  }
  0x4c   : > { %166 = vadd.xlane.f32.xlu1 %v165_v12  ;;  %v961_v36 = vstv %s517_s9  ;;  %v967_v46 = vstv %s518_s11  ;;  %s665_s26 = sshll.u32 %s737_s25, 4  ;;  %s666_s26 = int_to_ptr.vmem [resolvable:$false] %s665_s26 }
  0x4d   : > { %p663_p1 = pnand %p662_p9, %p1089_p0  ;;  %s667_s28 = scalar_lea.vmem %s666_s26, 4096 }
  0x4e   : > { %p668_p11 = scmp.lt.s32.totalorder %s1032_s15, %s666_s26  ;;  %p669_p13 = scmp.lt.s32.totalorder %s667_s28, %s661_s23 }
  0x4f   : > { %169 = vadd.xlane.f32.xlu0 %v168_v17  ;;  %p664_p2 = pneg %p663_p1 }
  0x50   : > { %172 = vadd.xlane.f32.xlu1 %v171_v18  ;;  %p670_p3 = por %p669_p13, %p668_p11 }
  0x52   : > { %p671_p5 = pnand %p670_p3, %p664_p2 }
  0x53   : > { %175 = vadd.xlane.f32.xlu0 %v174_v23 }
  0x54   : > { %178 = vadd.xlane.f32.xlu1 %v177_v24 }
  0xd4   : > { %v158_v26 = vpop.xlane.xlu0 %157 }
  0xd5   : > { %v180_v27 = vmul.f32 0.00390625, %v158_v26  ;;  %v164_v28 = vpop.xlane.xlu1 %163 }
  0xd6   : > { %v182_v29 = vmul.f32 0.00390625, %v164_v28 }
  0xd7   : > { %199 = vst.msk [vmem:[#allocation2 + $0x1] sm:$0xff] %vm188_vm0, %v180_v27 }
  0xd8   : > { %201 = vst.msk [vmem:[#allocation2 + $0x11] sm:$0xff] %vm188_vm0, %v182_v29  ;;  %v161_v30 = vpop.xlane.xlu0 %160 }
  0xd9   : > { %v181_v31 = vmul.f32 0.00390625, %v161_v30  ;;  %v167_v32 = vpop.xlane.xlu1 %166 }
  0xda   : > { %v183_v33 = vmul.f32 0.00390625, %v167_v32 }
  0xdb   : > { %200 = vst.msk [vmem:[#allocation2 + $0x9] sm:$0xff] %vm188_vm0, %v181_v31 }
  0xdc   : > { %202 = vst.msk [vmem:[#allocation2 + $0x19] sm:$0xff] %vm188_vm0, %v183_v33  ;;  %v170_v34 = vpop.xlane.xlu0 %169 }
  0xdd   : > { %v184_v37 = vmul.f32 0.00390625, %v170_v34  ;;  %v173_v38 = vpop.xlane.xlu1 %172 }
  0xde   : > { %v185_v39 = vmul.f32 0.00390625, %v173_v38  ;;  %v208_v40 = vld [vmem:[#allocation2] sm:$0xff] }
  0xdf   : > { %v234_v41 = vld [vmem:[#allocation2 + $0x1] sm:$0xff]  ;;  %203 = vst.msk [vmem:[#allocation2 + $0x21] sm:$0xff] %vm188_vm0, %v184_v37  ;;  %v217_v42 = vmul.f32 %v959_v35, %v208_v40  ;;  %v236_v44 = vld [vmem:[#allocation2 + $0x11] sm:$0xff] }
  0xe0   : > { %v243_v43 = vmul.f32 %v961_v36, %v234_v41  ;;  %204 = vst.msk [vmem:[#allocation2 + $0x29] sm:$0xff] %vm188_vm0, %v185_v39  ;;  %v176_v45 = vpop.xlane.xlu0 %175  ;;  %v245_v53 = vmul.f32 %v961_v36, %v236_v44 }
  0xe1   : > { %v186_v47 = vmul.f32 0.00390625, %v176_v45  ;;  %v179_v48 = vpop.xlane.xlu1 %178 }
  0xe2   : > { %v187_v49 = vmul.f32 0.00390625, %v179_v48  ;;  %v260_v50 = vld [vmem:[#allocation2 + $0x2] sm:$0xff]  ;;  %v251_v54 = vadd.f32 %v243_v43, %v217_v42  ;;  %v261_v58 = vld [vmem:[#allocation2 + $0xa] sm:$0xff] }
  0xe3   : > { %v209_v51 = vld [vmem:[#allocation2 + $0x8] sm:$0xff]  ;;  %205 = vst.msk [vmem:[#allocation2 + $0x31] sm:$0xff] %vm188_vm0, %v186_v47  ;;  %v269_v55 = vmul.f32 %v967_v46, %v260_v50  ;;  %v210_v59 = vld [vmem:[#allocation2 + $0x10] sm:$0xff]  ;;  %v270_v61 = vmul.f32 %v967_v46, %v261_v58  ;;  %v211_v0 = vld [vmem:[#allocation2 + $0x18] sm:$0xff] }
  0xe4   : > { %v235_v52 = vld [vmem:[#allocation2 + $0x9] sm:$0xff]  ;;  %v218_v56 = vmul.f32 %v959_v35, %v209_v51  ;;  %v262_v60 = vld [vmem:[#allocation2 + $0x12] sm:$0xff]  ;;  %206 = vst.msk [vmem:[#allocation2 + $0x39] sm:$0xff] %vm188_vm0, %v187_v49  ;;  %v219_v62 = vmul.f32 %v959_v35, %v210_v59  ;;  %v220_v12 = vmul.f32 %v959_v35, %v211_v0 }
  0xe5   : > { %v244_v57 = vmul.f32 %v961_v36, %v235_v52  ;;  %v271_v63 = vmul.f32 %v967_v46, %v262_v60  ;;  %v237_v4 = vld [vmem:[#allocation2 + $0x19] sm:$0xff]  ;;  %v277_v8 = vadd.f32 %v269_v55, %v251_v54 }
  0xe6   : > { %v246_v17 = vmul.f32 %v961_v36, %v237_v4  ;;  %v253_v18 = vadd.f32 %v245_v53, %v219_v62  ;;  %v263_v23 = vld [vmem:[#allocation2 + $0x1a] sm:$0xff] }
  0xe7   : > { %v252_v11 = vadd.f32 %v244_v57, %v218_v56  ;;  %v212_v24 = vld [vmem:[#allocation2 + $0x20] sm:$0xff]  ;;  %v519_v26 = vmul.f32 -1.442695, %v277_v8  ;;  %v272_v29 = vmul.f32 %v967_v46, %v263_v23  ;;  %v213_v31 = vld [vmem:[#allocation2 + $0x28] sm:$0xff] }
  0xe8   : > { %v238_v25 = vld [vmem:[#allocation2 + $0x21] sm:$0xff]  ;;  %v254_v28 = vadd.f32 %v246_v17, %v220_v12  ;;  %v239_v32 = vld [vmem:[#allocation2 + $0x29] sm:$0xff]  ;;  %v279_v33 = vadd.f32 %v271_v63, %v253_v18  ;;  %v221_v34 = vmul.f32 %v959_v35, %v212_v24  ;;  %v222_v41 = vmul.f32 %v959_v35, %v213_v31 }
  0xe9   : > { %v278_v27 = vadd.f32 %v270_v61, %v252_v11  ;;  %v264_v30 = vld [vmem:[#allocation2 + $0x22] sm:$0xff]  ;;  %v247_v37 = vmul.f32 %v961_v36, %v238_v25  ;;  %589 = vpow2.f32 %v519_v26  ;;  %v248_v44 = vmul.f32 %v961_v36, %v239_v32 }
  0xea   : > { %v273_v38 = vmul.f32 %v967_v46, %v264_v30  ;;  %v280_v40 = vadd.f32 %v272_v29, %v254_v28  ;;  %v521_v42 = vmul.f32 -1.442695, %v279_v33  ;;  %v265_v45 = vld [vmem:[#allocation2 + $0x2a] sm:$0xff] }
  0xeb   : > { %v520_v39 = vmul.f32 -1.442695, %v278_v27  ;;  %v255_v43 = vadd.f32 %v247_v37, %v221_v34  ;;  %v214_v47 = vld [vmem:[#allocation2 + $0x30] sm:$0xff]  ;;  %v274_v50 = vmul.f32 %v967_v46, %v265_v45  ;;  %v215_v53 = vld [vmem:[#allocation2 + $0x38] sm:$0xff]  ;;  %v256_v55 = vadd.f32 %v248_v44, %v222_v41 }
  0xec   : > { %v240_v48 = vld [vmem:[#allocation2 + $0x31] sm:$0xff]  ;;  %v522_v49 = vmul.f32 -1.442695, %v280_v40  ;;  %v223_v51 = vmul.f32 %v959_v35, %v214_v47  ;;  %v241_v57 = vld [vmem:[#allocation2 + $0x39] sm:$0xff]  ;;  %v224_v59 = vmul.f32 %v959_v35, %v215_v53 }
  0xed   : > { %591 = vpow2.f32 %v520_v39  ;;  %v266_v52 = vld [vmem:[#allocation2 + $0x32] sm:$0xff]  ;;  %v281_v54 = vadd.f32 %v273_v38, %v255_v43  ;;  %v249_v56 = vmul.f32 %v961_v36, %v240_v48  ;;  %v282_v61 = vadd.f32 %v274_v50, %v256_v55  ;;  %v267_v0 = vld [vmem:[#allocation2 + $0x3a] sm:$0xff] }
  0xee   : > { %593 = vpow2.f32 %v521_v42  ;;  %v275_v58 = vmul.f32 %v967_v46, %v266_v52  ;;  %v250_v63 = vmul.f32 %v961_v36, %v241_v57  ;;  %v276_v4 = vmul.f32 %v967_v46, %v267_v0 }
  0xef   : > { %595 = vpow2.f32 %v522_v49  ;;  %v523_v60 = vmul.f32 -1.442695, %v281_v54  ;;  %v257_v62 = vadd.f32 %v249_v56, %v223_v51  ;;  %v524_v11 = vmul.f32 -1.442695, %v282_v61 }
  0xf0   : > { %v258_v17 = vadd.f32 %v250_v63, %v224_v59 }
  0xf1   : > { %597 = vpow2.f32 %v523_v60  ;;  %v283_v12 = vadd.f32 %v275_v58, %v257_v62 }
  0xf2   : > { %v284_v26 = vadd.f32 %v276_v4, %v258_v17 }
  0xf3   : > { %v590_v8 = vpop.eup %589  ;;  %v525_v35 = vmul.f32 -1.442695, %v283_v12 }
  0xf4   : > { %v309_v18 = vadd.f32 1.0, %v590_v8  ;;  %v526_v36 = vmul.f32 -1.442695, %v284_v26 }
  0xf6   : > { %599 = vrcp.f32 %v309_v18 }
  0xf7   : > { %v592_v23 = vpop.eup %591  ;;  %601 = vpow2.f32 %v524_v11 }
  0xf8   : > { %v594_v24 = vpop.eup %593  ;;  %v310_v25 = vadd.f32 1.0, %v592_v23 }
  0xf9   : > { %v596_v27 = vpop.eup %595  ;;  %v311_v28 = vadd.f32 1.0, %v594_v24 }
  0xfa   : > { %603 = vrcp.f32 %v310_v25  ;;  %v312_v46 = vadd.f32 1.0, %v596_v27 }
  0xfb   : > { %605 = vpow2.f32 %v525_v35  ;;  %v598_v29 = vpop.eup %597 }
  0xfc   : > { %607 = vrcp.f32 %v311_v28  ;;  %v313_v31 = vadd.f32 1.0, %v598_v29 }
  0xfd   : > { %609 = vpow2.f32 %v526_v36 }
  0xfe   : > { %611 = vrcp.f32 %v312_v46 }
  0xff   : > { %613 = vrcp.f32 %v313_v31 }
 0x100   : > { %v600_v30 = vpop.eup %599 }
 0x101   : > { %v602_v32 = vpop.eup %601  ;;  %351 = vperm.xlu0 %587, %v600_v30  }
 0x102   : > { %v314_v34 = vadd.f32 1.0, %v602_v32 }
 0x104   : > { %v604_v33 = vpop.eup %603  ;;  %615 = vrcp.f32 %v314_v34 }
 0x105   : > { %356 = vperm.xlu1 %588, %v604_v33   ;;  %v606_v37 = vpop.eup %605 }
 0x106   : > { %v608_v38 = vpop.eup %607  ;;  %v315_v39 = vadd.f32 1.0, %v606_v37 }
 0x107   : > { %v610_v40 = vpop.eup %609 }
 0x108   : > { %v612_v41 = vpop.eup %611  ;;  %617 = vrcp.f32 %v315_v39  ;;  %v316_v42 = vadd.f32 1.0, %v610_v40 }
 0x109   : > { %361 = vperm.xlu1 %588, %v608_v38   ;;  %v614_v43 = vpop.eup %613 }
 0x10a   : > { %619 = vrcp.f32 %v316_v42 }
 0x10d   : > { %366 = vperm.xlu1 %588, %v612_v41  }
 0x10e   : > { %v616_v44 = vpop.eup %615 }
 0x111   : > { %371 = vperm.xlu1 %588, %v614_v43  }
 0x112   : > { %v618_v45 = vpop.eup %617 }
 0x114   : > { %v620_v47 = vpop.eup %619 }
 0x115   : > { %376 = vperm.xlu1 %588, %v616_v44  }
 0x119   : > { %381 = vperm.xlu1 %588, %v618_v45  }
 0x11d   : > { %386 = vperm.xlu1 %588, %v620_v47  }
 0x180   : > { %v352_v48 = vpop.permute.xlu0 %351 }
 0x181   : > { %v389_v49 = vmul.f32 %v352_v48, %v892_v1  ;;  %v390_v50 = vmul.f32 %v352_v48, %v895_v2 }
 0x183   : > { %405 = vst [vmem:[%s997_s12] sm:$0xff] %v389_v49  ;;  %406 = vst [vmem:[%s997_s12 + $0x8] sm:$0xff] %v390_v50 }
 0x184   : > { %v357_v51 = vpop.permute.xlu1 %356 }
 0x185   : > { %v391_v52 = vmul.f32 %v357_v51, %v906_v6  ;;  %v392_v1 = vmul.f32 %v357_v51, %v909_v7 }
 0x187   : > { %407 = vst [vmem:[%s997_s12 + $0x10] sm:$0xff] %v391_v52  ;;  %408 = vst [vmem:[%s997_s12 + $0x18] sm:$0xff] %v392_v1 }
 0x188   : > { %v362_v2 = vpop.permute.xlu1 %361 }
 0x189   : > { %v393_v53 = vmul.f32 %v362_v2, %v898_v3  ;;  %v394_v54 = vmul.f32 %v362_v2, %v903_v5 }
 0x18b   : > { %409 = vst [vmem:[%s997_s12 + $0x20] sm:$0xff] %v393_v53  ;;  %410 = vst [vmem:[%s997_s12 + $0x28] sm:$0xff] %v394_v54 }
 0x18c   : > { %v367_v55 = vpop.permute.xlu1 %366 }
 0x18d   : > { %v395_v56 = vmul.f32 %v367_v55, %v914_v9  ;;  %v396_v6 = vmul.f32 %v367_v55, %v917_v10 }
 0x18f   : > { %411 = vst [vmem:[%s997_s12 + $0x30] sm:$0xff] %v395_v56  ;;  %412 = vst [vmem:[%s997_s12 + $0x38] sm:$0xff] %v396_v6 }
 0x190   : > { %v372_v7 = vpop.permute.xlu1 %371 }
 0x191   : > { %v397_v3 = vmul.f32 %v372_v7, %v924_v13  ;;  %v398_v5 = vmul.f32 %v372_v7, %v927_v14 }
 0x193   : > { %413 = vst [vmem:[%s997_s12 + $0x40] sm:$0xff] %v397_v3  ;;  %414 = vst [vmem:[%s997_s12 + $0x48] sm:$0xff] %v398_v5 }
 0x194   : > { %v377_v57 = vpop.permute.xlu1 %376 }
 0x195   : > { %v399_v58 = vmul.f32 %v377_v57, %v930_v15  ;;  %v400_v9 = vmul.f32 %v377_v57, %v933_v16 }
 0x197   : > { %415 = vst [vmem:[%s997_s12 + $0x50] sm:$0xff] %v399_v58  ;;  %416 = vst [vmem:[%s997_s12 + $0x58] sm:$0xff] %v400_v9 }
 0x198   : > { %v382_v10 = vpop.permute.xlu1 %381 }
 0x199   : > { %v401_v59 = vmul.f32 %v382_v10, %v940_v19  ;;  %v402_v13 = vmul.f32 %v382_v10, %v943_v20 }
 0x19b   : > { %417 = vst [vmem:[%s997_s12 + $0x60] sm:$0xff] %v401_v59  ;;  %418 = vst [vmem:[%s997_s12 + $0x68] sm:$0xff] %v402_v13 }
 0x19c   : > { %v387_v14 = vpop.permute.xlu1 %386 }
 0x19d   : > { %v403_v15 = vmul.f32 %v387_v14, %v946_v21  ;;  %v404_v16 = vmul.f32 %v387_v14, %v949_v22 }
 0x19f   : > { %419 = vst [vmem:[%s997_s12 + $0x70] sm:$0xff] %v403_v15  ;;  %420 = vst [vmem:[%s997_s12 + $0x78] sm:$0xff] %v404_v16 }
 0x1a0   : > { %674 = shalt.err (!%p671_p5)
}
 0x1a1   : > { %s675_s4 = scalar_lea.hbm %s1030_s18, 2048  ;;  %s679_s8 = scalar_lea.hbm %s1082_s2, 4096 }
 0x1a2   : > { %p676_p7 = scmp.ne.s32.totalorder %s1030_s18, %s675_s4  ;;  %p680_p12 = scmp.lt.u32.totalorder %s1030_s18, %s1082_s2 }
 0x1a3   : > { %p681_p4 = scmp.lt.u32.totalorder %s679_s8, %s675_s4  ;;  %p683_p9 = scmp.lt.u32.totalorder %s675_s4, %s1030_s18 }
 0x1a4   : > { %p677_p8 = pnand %p676_p7, %p1089_p0 }
 0x1a5   : > { %p682_p6 = por %p681_p4, %p680_p12 }
 0x1a6   : > { %p678_p10 = pneg %p677_p8 }
 0x1a7   : > { %p684_p1 = por %p683_p9, %p682_p6 }
 0x1a9   : > { %p685_p2 = pnand %p684_p1, %p678_p10 }
 0x1ab   : > { %688 = shalt.err (!%p685_p2)
}
 0x1ac   : > { %s738_s29 = smov 256   ;;  %s739_s9 = smov 16  }
 0x1ad   : > { %536 = dma.vmem_to_hbm [thread:$0]  (%p1089_p0), %s1032_s15, 2048, %s1030_s18, %s422_s0, %s738_s29, %s738_s29, %s739_s9  }
 0x1ae PF: > { %s450_s11 = sand.u32 1, %s717_s19   ;;  %p1090_p11 = scmp.ne.s32.totalorder %s1087_s3, 0 }
 0x1af   : > { %p1091_p13 = scmp.ge.s32.totalorder %s729_s22, 2  ;;  %s451_s12 = scalar_lea.sflag [#allocation7], %s450_s11 }
 0x1b1   : > { %p543_p3 = pnand %p1091_p13, %p1090_p11 }
 0x1b3   : > { %712 = dma.done.wait (!%p543_p3), %s451_s12, 2048  }
 0x1b4   : > { %714 = vsyncadd (!%p543_p3), %s451_s12, 4294965248  ;;  %p19_p5 = scmp.ge.s32.totalorder %s792_s24, 4   ;;  %s1092_s19 = smov %s721_s20 }
 0x1b5   : > { %s1093_s20 = smov %s725_s21  ;;  %s1094_s21 = smov %s804_s27 }
 0x1b6   : > { %s1095_s22 = smov %s792_s24  ;;  %21 = sbr.rel (!%p19_p5) target bundleno = 17 (0x11), region = 69 }
 0x1bd   :  { %456 = vsyncpa [#allocation6], 1 }
 0x1be   :  { %458 = vsyncpa [#allocation6 + $0x1], 1 }
 0x1bf   :  { %459 = vsyncpa [#allocation7], 1 }
 0x1c0   :  { %461 = vsyncpa [#allocation7 + $0x1], 1 }

</bundles_post_ra>
